<compile_context>
chip_gen: v7x
topology: tpu7x:2x2x1
jax: 0.10.0
libtpu: 0.0.40
codegen_flags: <defaults>
</compile_context>

<pallas_src>
import jax
import jax.numpy as jnp
from jax import lax
from jax.experimental import pallas as pl
from jax.experimental.pallas import tpu as pltpu


_F_NORMALIZE_EPS = 1e-12   # torch.nn.functional.normalize default eps
_LAYER_NORM_EPS = 1e-5     # torch.nn.LayerNorm default eps


def _l2_normalize(v):
    # F.normalize(v, p=2, dim=-1): v / max(||v||_2, eps)
    nrm = jnp.sqrt(jnp.sum(v * v, axis=-1, keepdims=True))
    return v / jnp.maximum(nrm, _F_NORMALIZE_EPS)


# ---------------- kernels: one specialized body per strategy ----------------
# refs: x_ref/p_ref/o_ref are (TL, D); parameter refs are (1, 1) or (1, D).

def _kernel_default(x_ref, p_ref, o_ref):
    o_ref[...] = x_ref[...] + p_ref[...]


def _kernel_hardnorm(x_ref, p_ref, o_ref):
    x = x_ref[...].astype(jnp.float32)
    p = p_ref[...].astype(jnp.float32)
    o_ref[...] = (_l2_normalize(x) + _l2_normalize(p)).astype(o_ref.dtype)


def _kernel_learnable_scaling(x_ref, p_ref, scale_ref, o_ref):
    o_ref[...] = x_ref[...] + scale_ref[...] * p_ref[...]


def _kernel_weighted_sum(x_ref, p_ref, wi_ref, wp_ref, o_ref):
    x = x_ref[...].astype(jnp.float32)
    p = p_ref[...].astype(jnp.float32)
    out = wi_ref[...] * _l2_normalize(x) + wp_ref[...] * _l2_normalize(p)
    o_ref[...] = out.astype(o_ref.dtype)


def _kernel_weighted_sum_no_norm(x_ref, p_ref, wi_ref, wp_ref, o_ref):
    o_ref[...] = wi_ref[...] * x_ref[...] + wp_ref[...] * p_ref[...]


def _kernel_layer_norm(x_ref, p_ref, g_ref, b_ref, o_ref):
    c = (x_ref[...] + p_ref[...]).astype(jnp.float32)
    mu = jnp.mean(c, axis=-1, keepdims=True)
    var = jnp.mean(jnp.square(c - mu), axis=-1, keepdims=True)
    inv = lax.rsqrt(var + _LAYER_NORM_EPS)
    o_ref[...] = ((c - mu) * inv * g_ref[...] + b_ref[...]).astype(o_ref.dtype)


# ------------------------------ tiling helper --------------------------------

def _pick_row_tile(L, D, itemsize, vmem_budget_bytes=24 << 20):
    """Largest row tile that divides L and keeps 3 tiles x 2 buffers in budget."""
    for tl in (1024, 512, 256, 128, 64, 32, 16, 8):
        if L % tl == 0 and 6 * tl * D * itemsize <= vmem_budget_bytes:
            return tl
    if 6 * L * D * itemsize <= vmem_budget_bytes:
        return L
    return min(L, 512)   # ragged last block is masked by Pallas (row-local ops)


# --------------- positional_attention fallback (plain JAX) -------------------

def _positional_attention_jax(x, p, attn_params, num_heads=8):
    # TODO(synk): port this nn.MultiheadAttention mix path to a Pallas flash-attention kernel.
    B, L, D = x.shape
    h = D // num_heads
    p = jnp.broadcast_to(p, (B, L, D))
    q = jnp.swapaxes(x, 0, 1)       # (L, B, D) — torch MHA batch_first=False layout
    kv = jnp.swapaxes(p, 0, 1)
    wq, wk, wv = jnp.split(attn_params["in_proj_weight"], 3, axis=0)
    bq, bk, bv = jnp.split(attn_params["in_proj_bias"], 3, axis=0)
    qh = (q @ wq.T + bq).reshape(L, B, num_heads, h)
    kh = (kv @ wk.T + bk).reshape(L, B, num_heads, h)
    vh = (kv @ wv.T + bv).reshape(L, B, num_heads, h)
    logits = jnp.einsum("qbhd,kbhd->bhqk", qh, kh) / jnp.sqrt(jnp.float32(h))
    attn = jax.nn.softmax(logits, axis=-1)
    ctx = jnp.einsum("bhqk,kbhd->qbhd", attn, vh).reshape(L, B, D)
    attn_out = ctx @ attn_params["out_proj_weight"].T + attn_params["out_proj_bias"]
    return jnp.swapaxes(q + attn_out, 0, 1)


# ------------------------------- public wrapper -------------------------------

def vision_transformer_embedding(inputs_embeds, position_embeds, strategy, *,
                                 position_scale=None, input_weight=None,
                                 position_weight=None, ln_gamma=None, ln_beta=None,
                                 attn_params=None):
    """inputs_embeds: [B, L, D]; position_embeds: [B or 1, L, D] (or [L, D])."""
    x = jnp.asarray(inputs_embeds)
    p = jnp.asarray(position_embeds)
    if p.ndim == 2:
        p = p[None]
    B, L, D = x.shape
    Bp = p.shape[0]
    assert p.shape[1:] == (L, D) and Bp in (1, B), (x.shape, p.shape)

    if strategy == "positional_attention":
        return _positional_attention_jax(x, p, attn_params)

    def _row(v):
        return jnp.asarray(v, x.dtype).reshape(1, -1)

    if strategy == "default":
        kernel, extras = _kernel_default, []
    elif strategy == "hardcoded_normalization":
        kernel, extras = _kernel_hardnorm, []
    elif strategy in ("learnable_scaling", "learnable_scaling_vec"):
        kernel, extras = _kernel_learnable_scaling, [_row(position_scale)]
    elif strategy in ("weighted_sum", "weighted_sum_vec"):
        kernel, extras = _kernel_weighted_sum, [_row(input_weight), _row(position_weight)]
    elif strategy in ("weighted_sum_no_norm", "weighted_sum_no_norm_vec"):
        kernel, extras = _kernel_weighted_sum_no_norm, [_row(input_weight), _row(position_weight)]
    elif strategy == "layer_norm":
        kernel, extras = _kernel_layer_norm, [_row(ln_gamma), _row(ln_beta)]
    else:
        raise ValueError(f"Unsupported PE_mix_strategy: {strategy}")

    itemsize = x.dtype.itemsize
    TL = _pick_row_tile(L, D, itemsize)
    grid = (B, pl.cdiv(L, TL))

    x_spec = pl.BlockSpec((None, TL, D), lambda b, i: (b, i, 0))
    # Position embeddings with batch 1 are broadcast via the index_map — the
    # (B, L, D) expand is never materialized in HBM.
    if Bp == 1:
        p_spec = pl.BlockSpec((None, TL, D), lambda b, i: (0, i, 0))
    else:
        p_spec = pl.BlockSpec((None, TL, D), lambda b, i: (b, i, 0))
    extra_specs = [pl.BlockSpec((1, e.shape[1]), lambda b, i: (0, 0)) for e in extras]
    out_spec = pl.BlockSpec((None, TL, D), lambda b, i: (b, i, 0))

    bytes_accessed = (2 * x.size + p.size) * itemsize + sum(e.size * itemsize for e in extras)
    cost = pl.CostEstimate(flops=12 * x.size, transcendentals=0,
                           bytes_accessed=bytes_accessed)

    return pl.pallas_call(
        kernel,
        out_shape=jax.ShapeDtypeStruct((B, L, D), x.dtype),
        grid=grid,
        in_specs=[x_spec, p_spec] + extra_specs,
        out_specs=out_spec,
        compiler_params=pltpu.CompilerParams(
            dimension_semantics=("parallel", "parallel")),
        cost_estimate=cost,
    )(x, p, *extras)


# ------------------------------ pure-JAX reference ----------------------------

def _reference(x, p, strategy, *, position_scale=None, input_weight=None,
               position_weight=None, ln_gamma=None, ln_beta=None):
    def row3(v):
        return jnp.asarray(v, jnp.float32).reshape(1, 1, -1)
    if strategy == "default":
        return x + p
    if strategy == "hardcoded_normalization":
        return _l2_normalize(x) + _l2_normalize(p)
    if strategy in ("learnable_scaling", "learnable_scaling_vec"):
        return x + row3(position_scale) * p
    if strategy in ("weighted_sum", "weighted_sum_vec"):
        return row3(input_weight) * _l2_normalize(x) + row3(position_weight) * _l2_normalize(p)
    if strategy in ("weighted_sum_no_norm", "weighted_sum_no_norm_vec"):
        return row3(input_weight) * x + row3(position_weight) * p
    if strategy == "layer_norm":
        c = x + p
        mu = jnp.mean(c, axis=-1, keepdims=True)
        var = jnp.mean(jnp.square(c - mu), axis=-1, keepdims=True)
        return (c - mu) * lax.rsqrt(var + _LAYER_NORM_EPS) * row3(ln_gamma) + row3(ln_beta)
    raise ValueError(strategy)


if __name__ == "__main__":
    key = jax.random.PRNGKey(0)
    B, L, D = 2, 8, 32
    k1, k2, k3, k4, k5, k6, k7 = jax.random.split(key, 7)

    inputs_embeds = jax.random.normal(k1, (B, L, D), jnp.float32)
    position_embeds = jax.random.normal(k2, (1, L, D), jnp.float32)  # broadcast over batch

    position_scale_vec = 1.0 + 0.1 * jax.random.normal(k3, (1, D), jnp.float32)
    input_weight_vec = 1.0 + 0.1 * jax.random.normal(k4, (1, D), jnp.float32)
    position_weight_vec = 1.0 + 0.1 * jax.random.normal(k5, (1, D), jnp.float32)
    position_scale_sc = jnp.asarray([1.3], jnp.float32)
    input_weight_sc = jnp.asarray([0.7], jnp.float32)
    position_weight_sc = jnp.asarray([1.1], jnp.float32)
    ln_gamma = 1.0 + 0.1 * jax.random.normal(k6, (D,), jnp.float32)
    ln_beta = 0.1 * jax.random.normal(k7, (D,), jnp.float32)

    cases = [
        ("default", {}),
        ("hardcoded_normalization", {}),
        ("learnable_scaling", dict(position_scale=position_scale_sc)),
        ("learnable_scaling_vec", dict(position_scale=position_scale_vec)),
        ("weighted_sum_vec", dict(input_weight=input_weight_vec,
                                  position_weight=position_weight_vec)),
        ("weighted_sum_no_norm", dict(input_weight=input_weight_sc,
                                      position_weight=position_weight_sc)),
        ("layer_norm", dict(ln_gamma=ln_gamma, ln_beta=ln_beta)),
    ]

    for strategy, params in cases:
        out = vision_transformer_embedding(inputs_embeds, position_embeds, strategy, **params)
        out = jax.block_until_ready(out)
        ref = _reference(inputs_embeds, position_embeds, strategy, **params)
        assert out.shape == (B, L, D), (strategy, out.shape)
        assert jnp.allclose(out, ref, atol=1e-5, rtol=1e-5), f"mismatch: {strategy}"

    print("KERNEL_OK")
</pallas_src>

<mosaic_0001>
module attributes {stable_mosaic.version = 11 : i64} {
  func.func @_kernel_default(%arg0: i32, %arg1: i32, %arg2: memref<1x8x32xf32, #tpu.memory_space<vmem>>, %arg3: memref<1x8x32xf32, #tpu.memory_space<vmem>>, %arg4: memref<1x8x32xf32, #tpu.memory_space<vmem>>) attributes {dimension_semantics = [#tpu.dimension_semantics<parallel>, #tpu.dimension_semantics<parallel>], iteration_bounds = array<i64: 2, 1>, scalar_prefetch = 0 : i64, scratch_operands = 0 : i64, tpu.core_type = #tpu.core_type<tc>, window_params = [{transform_indices = @transform_0, window_bounds = array<i64: 1, 8, 32>}, {transform_indices = @transform_1, window_bounds = array<i64: 1, 8, 32>}, {transform_indices = @transform_2, window_bounds = array<i64: 1, 8, 32>}]} {
    %c0 = arith.constant 0 : index
    %c0_0 = arith.constant 0 : index
    %c0_1 = arith.constant 0 : index
    %0 = vector.load %arg2[%c0, %c0_0, %c0_1] : memref<1x8x32xf32, #tpu.memory_space<vmem>>, vector<1x8x32xf32>
    %1 = vector.shape_cast %0 : vector<1x8x32xf32> to vector<8x32xf32>
    %c0_2 = arith.constant 0 : index
    %c0_3 = arith.constant 0 : index
    %c0_4 = arith.constant 0 : index
    %2 = vector.load %arg3[%c0_2, %c0_3, %c0_4] : memref<1x8x32xf32, #tpu.memory_space<vmem>>, vector<1x8x32xf32>
    %3 = vector.shape_cast %2 : vector<1x8x32xf32> to vector<8x32xf32>
    %4 = arith.addf %1, %3 : vector<8x32xf32>
    %c0_5 = arith.constant 0 : index
    %c0_6 = arith.constant 0 : index
    %c0_7 = arith.constant 0 : index
    %5 = vector.load %arg4[%c0_5, %c0_6, %c0_7] : memref<1x8x32xf32, #tpu.memory_space<vmem>>, vector<1x8x32xf32>
    %6 = vector.shape_cast %5 : vector<1x8x32xf32> to vector<8x32xf32>
    %7 = vector.shape_cast %4 : vector<8x32xf32> to vector<1x8x32xf32>
    tpu.vector_store %arg4[%c0_5, %c0_6, %c0_7], %7 {strides = array<i32>} : memref<1x8x32xf32, #tpu.memory_space<vmem>>, vector<1x8x32xf32>,
    return
  }
  func.func @transform_0(%arg0: i32, %arg1: i32) -> (i32, i32, i32) {
    %c0_i32 = arith.constant 0 : i32
    %c0_i32_0 = arith.constant 0 : i32
    return %arg0, %arg1, %c0_i32 : i32, i32, i32
  }
  func.func @transform_1(%arg0: i32, %arg1: i32) -> (i32, i32, i32) {
    %c0_i32 = arith.constant 0 : i32
    %c0_i32_0 = arith.constant 0 : i32
    %c0_i32_1 = arith.constant 0 : i32
    return %c0_i32, %arg1, %c0_i32_0 : i32, i32, i32
  }
  func.func @transform_2(%arg0: i32, %arg1: i32) -> (i32, i32, i32) {
    %c0_i32 = arith.constant 0 : i32
    %c0_i32_0 = arith.constant 0 : i32
    return %arg0, %arg1, %c0_i32 : i32, i32, i32
  }
}

</mosaic_0001>

<bundles_post_ra>
// kernel: tpu_custom_call.1
= control target key start
LH: loop header
LB: loop body
LE: loop exit
PB: predicated region body
PF: predicated region fallthrough
CT: control target
= control target key end

     0   :  { %7 = vsyncpa [#allocation3], 0  ;;  %s776_s0 = inlined_call_operand.hbm [shape: f32[2,8,32], index: 0, kind: input, shape index: {}]   ;;  %s777_s1 = inlined_call_operand.hbm [shape: f32[1,8,32], index: 1, kind: input, shape index: {}]   ;;  %s778_s2 = inlined_call_operand.hbm [shape: f32[2,8,32], index: 2, kind: output, shape index: {}]  }
   0x1   :  { %9 = vsyncpa [#allocation3 + $0x1], 0 }
   0x2   :  { %10 = vsyncpa [#allocation6], 0 }
   0x3   :  { %11 = vsyncpa [#allocation4], 0 }
   0x4   :  { %13 = vsyncpa [#allocation4 + $0x1], 0  ;;  %s560_s9 = smov 0   ;;  %s562_s10 = smov 0  }
   0x5   :  { %s564_s11 = smov 0   ;;  %s566_s12 = smov 0  }
   0x6   :  { %s568_s13 = smov 0   ;;  %s570_s14 = smov 0  }
   0x7 LB: > { %s308_s15 = sadd.s32 4294967295, %s540_s14   ;;  %s309_s16 = sadd.s32 4294967294, %s540_s14   ;;  %s540_s14 = sphi %s570_s14, %s19_s14   ;;  %s536_s13 = sphi %s568_s13, %s803_s13   ;;  %s532_s12 = sphi %s566_s12, %s802_s12   ;;  %s528_s11 = sphi %s564_s11, %s801_s11   ;;  %s524_s10 = sphi %s562_s10, %s800_s10   ;;  %s520_s9 = sphi %s560_s9, %s799_s9  }
   0x8   : > { %p53_p0 = scmp.ne.s32.totalorder %s524_s10, %s520_s9  ;;  %p594_p1 = scmp.eq.s32.totalorder %s308_s15, 0 }
   0x9   : > { %p598_p2 = scmp.eq.s32.totalorder %s308_s15, 1  ;;  %p111_p3 = scmp.eq.s32.totalorder %s309_s16, 1 }
   0xa   : > { %s783_s17 = scalar_select %p594_p1, 1, 0 }
   0xb   : > { %s784_s18 = scalar_select %p598_p2, 1, 0 }
   0xc   : > { %p604_p4 = por %p594_p1, %p53_p0  ;;  %p310_p5 = scmp.ge.s32.totalorder %s540_s14, 1 }
   0xd   : > { %p609_p6 = por %p111_p3, %p53_p0  ;;  %p118_p7 = scmp.lt.s32.totalorder %s540_s14, 3 }
   0xe   : > { %s785_s19 = scalar_select %p604_p4, 1, 0 }
   0xf   : > { %s786_s20 = scalar_select %p609_p6, 1, 0 }
  0x10   : > { %p614_p8 = pnand %p310_p5, %p118_p7  ;;  %s542_s22 = smov [#allocation5]  }
  0x11   : > { %s133_s23 = sshll.u32 %s542_s22, 4  ;;  %s31_s25 = sadd.s32 1, %s536_s13  ;;  %s134_s23 = int_to_ptr.vmem [resolvable:$true] %s133_s23 }
  0x12   : > { %s787_s21 = scalar_select %p614_p8, 1, 0 }
  0x13   : > { %p331_p10 = pneg %p614_p8  ;;  %s40_s26 = sadd.s32 1, %s528_s11 }
  0x14   : > { %p629_p12 = scmp.ge.s32.totalorder %s31_s25, 2  ;;  %s396_s30 = scalar_lea.hbm %s777_s1, 128 }
  0x15   : > { %p623_p11 = pnand %p331_p10, %p594_p1  ;;  %p397_p13 = scmp.ne.s32.totalorder %s777_s1, %s396_s30 }
  0x16   : > { %s789_s27 = scalar_select %p629_p12, 1, 0 }
  0x17   : > { %p398_p0 = pneg %p623_p11  ;;  %p403_p7 = scmp.lt.u32.totalorder %s396_s30, %s777_s1 }
  0x19   : > { %p399_p3 = pnand %p398_p0, %p397_p13 }
  0x1b   : > { %p400_p5 = pneg %p399_p3 }
  0x1d   : > { %p405_p10 = pnand %p403_p7, %p400_p5 }
  0x1f   : > { %408 = shalt.err (!%p405_p10)
}
  0x20   : > { %s409_s7 = scalar_lea.vmem %s134_s23, 128  ;;  %p417_p4 = scmp.lt.s32.totalorder %s134_s23, %s134_s23 }
  0x21   : > { %p410_p9 = scmp.ne.s32.totalorder %s134_s23, %s409_s7  ;;  %p418_p8 = scmp.lt.s32.totalorder %s409_s7, %s409_s7 }
  0x23   : > { %p412_p6 = pnand %p410_p9, %p398_p0  ;;  %p419_p2 = por %p418_p8, %p417_p4 }
  0x25   : > { %p413_p1 = pneg %p412_p6 }
  0x27   : > { %p420_p12 = pnand %p419_p2, %p413_p1 }
  0x29   : > { %423 = shalt.err (!%p420_p12)
}
  0x2a   : > { %334 = dma.hbm_to_vmem [thread:$0]  (!%p623_p11), %s777_s1, 128, %s134_s23, [#allocation6]  }
  0x2b   : > { %p790_p4 = scmp.ne.s32.totalorder %s789_s27, 0  ;;  %p47_p1 = scmp.ne.s32.totalorder %s528_s11, %s524_s10 }
  0x2c   : > { %p48_p2 = scmp.eq.s32.totalorder %s540_s14, 0  ;;  %p344_p6 = scmp.lt.s32.totalorder %s540_s14, 2 }
  0x2d   : > { %s805_s25 = smov (%p790_p4, %s31_s25), 0  ;;  %p791_p12 = scmp.ne.s32.totalorder %s784_s18, 0 }
  0x2e   : > { %s35_s16 = ssub.s32 %s536_s13, %s805_s25  ;;  %p49_p9 = por %p48_p2, %p47_p1 }
  0x2f   : > { %p38_p8 = scmp.eq.s32.totalorder %s35_s16, 0  ;;  %p661_p13 = por %p791_p12, %p47_p1 }
  0x30   : > { %s144_s24 = sand.u32 1, %s528_s11   ;;  %s314_s27 = sshll.u32 %s536_s13, 7 }
  0x31   : > { %s669_s28 = scalar_select %p38_p8, %s528_s11, %s40_s26  }
  0x32   : > { %s313_s23 = sshll.u32 %s144_s24, 3  ;;  %s675_s3 = scalar_lea.hbm %s776_s0, %s314_s27 }
  0x33   : > { %s148_s18 = scalar_lea.vmem [#allocation2], %s313_s23  ;;  %p679_p11 = pnand %p344_p6, %p49_p9 }
  0x34   : > { %s156_s4 = sshll.u32 %s148_s18, 4  ;;  %s145_s26 = scalar_lea.sflag [#allocation3], %s144_s24  ;;  %s677_s4 = int_to_ptr.vmem [resolvable:$true] %s156_s4 }
  0x35   : > { %s424_s6 = scalar_lea.hbm %s675_s3, 128  ;;  %p426_p3 = pneg %p679_p11 }
  0x36   : > { %p425_p0 = scmp.ne.s32.totalorder %s675_s3, %s424_s6  ;;  %s429_s15 = scalar_lea.hbm %s776_s0, 256 }
  0x37   : > { %p430_p10 = scmp.lt.u32.totalorder %s675_s3, %s776_s0  ;;  %p431_p4 = scmp.lt.u32.totalorder %s429_s15, %s424_s6 }
  0x38   : > { %p427_p5 = pnand %p426_p3, %p425_p0  ;;  %p433_p2 = scmp.lt.u32.totalorder %s424_s6, %s675_s3 }
  0x39   : > { %p432_p1 = por %p431_p4, %p430_p10 }
  0x3a   : > { %p428_p7 = pneg %p427_p5 }
  0x3b   : > { %p434_p6 = por %p433_p2, %p432_p1 }
  0x3d   : > { %p435_p8 = pnand %p434_p6, %p428_p7 }
  0x3f   : > { %438 = shalt.err (!%p435_p8)
}
  0x40   : > { %s439_s24 = scalar_lea.vmem %s677_s4, 128  ;;  %s543_s27 = smov [#allocation2]  }
  0x41   : > { %p440_p9 = scmp.ne.s32.totalorder %s677_s4, %s439_s24  ;;  %s444_s29 = sshll.u32 %s543_s27, 4  ;;  %s445_s29 = int_to_ptr.vmem [resolvable:$false] %s444_s29 }
  0x42   : > { %s446_s30 = scalar_lea.vmem %s445_s29, 256  ;;  %p447_p5 = scmp.lt.s32.totalorder %s677_s4, %s445_s29 }
  0x43   : > { %p442_p12 = pnand %p440_p9, %p426_p3  ;;  %p448_p10 = scmp.lt.s32.totalorder %s446_s30, %s439_s24 }
  0x45   : > { %p443_p0 = pneg %p442_p12  ;;  %p449_p4 = por %p448_p10, %p447_p5 }
  0x47   : > { %p450_p1 = pnand %p449_p4, %p443_p0 }
  0x49   : > { %453 = shalt.err (!%p450_p1)
}
  0x4a   : > { %338 = dma.hbm_to_vmem [thread:$0]  (!%p679_p11), %s675_s3, 128, %s677_s4, %s145_s26  }
  0x4b   : > { %p794_p7 = scmp.ne.s32.totalorder %s787_s21, 0 }
  0x4c   : > { %s711_s18 = sand.u32 (!%p794_p7), 1, %s524_s10   ;;  %p795_p3 = scmp.ne.s32.totalorder (!%p794_p7), %s785_s19, 0 }
  0x4d   : > { %165 = sbr.rel (%p794_p7) target bundleno = 113 (0x71), region = 28  ;;  %s316_s6 = sshll.u32 (!%p794_p7), %s711_s18, 3 }
  0x4e   : > { %s168_s7 = scalar_lea.sflag (!%p794_p7), [#allocation3], %s711_s18  ;;  %s171_s8 = scalar_lea.vmem (!%p794_p7), [#allocation2], %s316_s6 }
  0x54   : > { %507 = dma.done.wait (%p795_p3), %s168_s7, 128  }
  0x55   : > { %509 = vsyncadd (%p795_p3), %s168_s7, 4294967168  ;;  %p796_p2 = scmp.ne.s32.totalorder %s783_s17, 0 }
  0x57   : > { %511 = dma.done.wait (%p796_p2), [#allocation6], 128  }
  0x58   : > { %513 = vsyncadd (%p796_p2), [#allocation6], 4294967168  ;;  %s195_s21 = scalar_lea.vmem [#allocation7], %s316_s6  ;;  %s320_s4 = sshll.u32 %s532_s12, 7  ;;  %v196_v0 = vld [vmem:[%s171_s8] sm:$0xff]  ;;  %v197_v1 = vld [vmem:[#allocation5] sm:$0xff] }
  0x59   : > { %s216_s3 = sshll.u32 %s195_s21, 4  ;;  %vm199_vm0 = vcmask 261120   ;;  %v198_v2 = vadd.f32 %v197_v1, %v196_v0  ;;  %s729_s17 = scalar_lea.hbm %s778_s2, %s320_s4  ;;  %s724_s3 = int_to_ptr.vmem [resolvable:$true] %s216_s3 }
  0x5a   : > { %s202_s26 = scalar_lea.sflag [#allocation4], %s711_s18  ;;  %s454_s15 = scalar_lea.vmem %s724_s3, 128 }
  0x5b   : > { %200 = vst.msk [vmem:[%s195_s21] sm:$0xff] %vm199_vm0, %v198_v2  ;;  %p455_p11 = scmp.ne.s32.totalorder %s724_s3, %s454_s15  ;;  %s544_s12 = smov [#allocation7]  }
  0x5c   : > { %s458_s16 = sshll.u32 %s544_s12, 4  ;;  %s459_s16 = int_to_ptr.vmem [resolvable:$false] %s458_s16 }
  0x5d   : > { %p456_p6 = pnand %p455_p11, %p661_p13  ;;  %s460_s23 = scalar_lea.vmem %s459_s16, 256 }
  0x5e   : > { %p461_p9 = scmp.lt.s32.totalorder %s724_s3, %s459_s16  ;;  %p462_p12 = scmp.lt.s32.totalorder %s460_s23, %s454_s15 }
  0x5f   : > { %p457_p8 = pneg %p456_p6 }
  0x60   : > { %p463_p0 = por %p462_p12, %p461_p9 }
  0x62   : > { %p464_p5 = pnand %p463_p0, %p457_p8 }
  0x64   : > { %467 = shalt.err (!%p464_p5)
}
  0x65   : > { %s468_s24 = scalar_lea.hbm %s729_s17, 128  ;;  %s472_s30 = scalar_lea.hbm %s778_s2, 256 }
  0x66   : > { %p469_p10 = scmp.ne.s32.totalorder %s729_s17, %s468_s24  ;;  %p473_p7 = scmp.lt.u32.totalorder %s729_s17, %s778_s2 }
  0x67   : > { %p474_p3 = scmp.lt.u32.totalorder %s472_s30, %s468_s24  ;;  %p476_p11 = scmp.lt.u32.totalorder %s468_s24, %s729_s17 }
  0x68   : > { %p470_p4 = pnand %p469_p10, %p661_p13 }
  0x69   : > { %p475_p2 = por %p474_p3, %p473_p7 }
  0x6a   : > { %p471_p1 = pneg %p470_p4 }
  0x6b   : > { %p477_p6 = por %p476_p11, %p475_p2 }
  0x6d   : > { %p478_p8 = pnand %p477_p6, %p471_p1 }
  0x6f   : > { %481 = shalt.err (!%p478_p8)
}
  0x70   : > { %329 = dma.vmem_to_hbm [thread:$0]  (%p661_p13), %s724_s3, 128, %s729_s17, %s202_s26  }
  0x71 PF: > { %s228_s7 = sand.u32 1, %s520_s9   ;;  %p797_p9 = scmp.ne.s32.totalorder %s786_s20, 0 }
  0x72   : > { %p798_p12 = scmp.ge.s32.totalorder %s540_s14, 2  ;;  %s229_s8 = scalar_lea.sflag [#allocation4], %s228_s7 }
  0x74   : > { %p340_p0 = pnand %p798_p12, %p797_p9 }
  0x76   : > { %515 = dma.done.wait (!%p340_p0), %s229_s8, 128  }
  0x77   : > { %517 = vsyncadd (!%p340_p0), %s229_s8, 4294967168  ;;  %s19_s14 = sadd.s32 1, %s540_s14   ;;  %s799_s9 = smov %s524_s10 }
  0x78   : > { %p16_p5 = scmp.ge.s32.totalorder %s19_s14, 4   ;;  %s800_s10 = smov %s528_s11 }
  0x79   : > { %s801_s11 = smov %s669_s28  ;;  %s802_s12 = smov %s536_s13 }
  0x7a   : > { %s803_s13 = smov %s805_s25  ;;  %18 = sbr.rel (!%p16_p5) target bundleno = 7 (0x7), region = 78 }
  0x81   :  { %234 = vsyncpa [#allocation3], 1 }
  0x82   :  { %236 = vsyncpa [#allocation3 + $0x1], 1 }
  0x83   :  { %237 = vsyncpa [#allocation6], 1 }
  0x84   :  { %238 = vsyncpa [#allocation4], 1 }
  0x85   :  { %240 = vsyncpa [#allocation4 + $0x1], 1 }

</bundles_post_ra>
